<compile_context>
chip_gen: v6e
topology: v6e:2x2x1
jax: 0.10.0
libtpu: 0.0.40
codegen_flags: <defaults>
</compile_context>

<pallas_src>
import functools

import jax
import jax.numpy as jnp
from jax import lax
from jax.experimental import pallas as pl
from jax.experimental.pallas import tpu as pltpu


_LANE = 1024            # lane-dense width used by the small-L fallback path
_SUB = 8                # sublane quantum / per-block partial-sum rows
_MAX_COL_TILE = 2048    # widest single column block before columns are tiled
_SMALL_L = 64           # below this label count, use the lane-dense fallback


def _round_up(x, m):
    return ((x + m - 1) // m) * m


def _round_down(x, m):
    return (x // m) * m


def _vmem_capacity_bytes():
    try:
        return int(pltpu.get_tpu_info().vmem_capacity_bytes)
    except Exception:
        return 128 * 1024 * 1024       # v5e / v6e default


def _focal_partial_kernel(pred_ref, tgt_ref, out_ref, acc_ref, *,
                          alpha, gamma, rows, cols, tile_b, tile_l,
                          sub_rows, n_chunks, mask_rows, mask_cols):
    """Partial focal-loss sum of one (tile_b, tile_l) block.

    The block is processed in (sub_rows, tile_l) sub-chunks accumulated into
    an f32 VMEM scratch so live f32 temporaries stay bounded independent of
    the DMA tile size; a single cross-lane reduce happens at the end.
    """
    row0 = pl.program_id(0) * tile_b
    col0 = pl.program_id(1) * tile_l

    def _elem(p_raw, t_raw, row_off):
        p = p_raw.astype(jnp.float32)
        t = t_raw.astype(jnp.float32)

        is_pos = t > 0.5                                 # target == 1
        sel = jnp.where(is_pos, p, 1.0 - p)              # prob of true class
        probs = jnp.clip(sel, 0.0001, 1.0)               # clamp(1e-4, 1.0)

        if mask_rows or mask_cols:                       # ragged grid edges
            ok = None
            if mask_rows:
                r = lax.broadcasted_iota(jnp.int32, probs.shape, 0)
                ok = (r + (row0 + row_off)) < rows
            if mask_cols:
                c = lax.broadcasted_iota(jnp.int32, probs.shape, 1)
                okc = (c + col0) < cols
                ok = okc if ok is None else jnp.logical_and(ok, okc)
            probs = jnp.where(ok, probs, 1.0)            # masked -> zero loss

        log_p = jnp.log(probs)                           # EUP transcendental
        a_neg = jnp.where(is_pos, -alpha, alpha - 1.0)   # fold the negation
        q = 1.0 - probs

        if isinstance(gamma, int):                       # static int -> VPU
            if gamma <= 0:
                mod = jnp.ones_like(q)
            else:
                mod = q
                for _ in range(gamma - 1):
                    mod = mod * q
        else:
            # Non-integer gamma: guard q == 0 (probs == 1, incl. padded /
            # masked elements) so the exp(gamma*log(q)) lowering of pow
            # cannot produce NaN/Inf that would poison the partial sum.
            mod = jnp.where(q > 0.0,
                            jnp.exp(gamma * jnp.log(jnp.maximum(q, 1e-30))),
                            0.0)

        return a_neg * mod * log_p                       # >= 0 elementwise

    if n_chunks == 1:
        partial = jnp.sum(_elem(pred_ref[...], tgt_ref[...], 0))
    else:
        acc_ref[...] = jnp.zeros_like(acc_ref)

        @pl.loop(0, n_chunks)
        def _(c):
            r0 = pl.multiple_of(c * sub_rows, sub_rows)
            acc_ref[...] += _elem(pred_ref[pl.ds(r0, sub_rows), :],
                                  tgt_ref[pl.ds(r0, sub_rows), :], r0)

        partial = jnp.sum(acc_ref[...])                  # one XLU reduce/block

    # Lane-dense (8,128) constant-filled output block (unmasked full store).
    out_ref[...] = jnp.full(out_ref.shape, partial, dtype=out_ref.dtype)


def _focal_partial_sums(pred2d, tgt2d, *, alpha, gamma, max_tile_rows,
                        allow_input_fusion=False):
    """Sum of per-element focal losses over a 2-D array, via partial sums."""
    R, C = pred2d.shape

    # --- column blocking: one full-width block when it fits, else 1024-lane
    # blocks with the ragged tail masked in-kernel. ---
    if C <= _MAX_COL_TILE:
        tile_l = C
    else:
        tile_l = 1024
    num_cols = pl.cdiv(C, tile_l)
    tl_pad = _round_up(tile_l, 128)          # VMEM lanes actually occupied

    # --- row blocking: as big as the per-generation VMEM budget allows. ---
    cap = _vmem_capacity_bytes()
    budget = int(0.6 * cap)
    in_bytes = pred2d.dtype.itemsize + tgt2d.dtype.itemsize
    sub_target = 64
    fixed = 12 * sub_target * tl_pad * 4 + 4 * 1024 * 1024
    per_row = 2 * tl_pad * in_bytes          # double-buffered input DMA rows
    tile_b = max(_SUB, (budget - fixed) // max(per_row, 1))
    tile_b = min(tile_b, int(max_tile_rows))
    if R < _SUB:
        tile_b = R                           # block dim == full dim is legal
    else:
        if tile_b >= 128:
            tile_b = _round_down(tile_b, 64)
        tile_b = max(_SUB, min(_round_down(tile_b, _SUB),
                               _round_down(R, _SUB)))
        # Keep >= 2 row blocks so the "parallel" grid can shard across both
        # TensorCores on v7x (harmless on single-TC v5e/v6e).
        if R >= 2 * _SUB and pl.cdiv(R, tile_b) < 2:
            cand = _round_up(pl.cdiv(R, 2), 64)
            if cand > _round_down(R, _SUB):
                cand = _round_up(pl.cdiv(R, 2), _SUB)
            tile_b = max(_SUB, min(tile_b, cand))
    num_rows = pl.cdiv(R, tile_b)

    # Sub-chunk rows for bounded in-kernel f32 temporaries.
    if tile_b <= sub_target:
        sub_rows = tile_b
    else:
        sub_rows = sub_target
        while tile_b % sub_rows:             # tile_b is a multiple of 8
            sub_rows //= 2
    n_chunks = tile_b // sub_rows

    mask_rows = (R % tile_b) != 0
    mask_cols = (C % tile_l) != 0

    kernel = functools.partial(
        _focal_partial_kernel, alpha=float(alpha), gamma=gamma,
        rows=R, cols=C, tile_b=tile_b, tile_l=tile_l,
        sub_rows=sub_rows, n_chunks=n_chunks,
        mask_rows=mask_rows, mask_cols=mask_cols)

    # VMEM: double-buffered input tiles + scratch accumulator + f32 temps.
    vmem_est = (2 * tile_b * tl_pad * in_bytes
                + 12 * sub_rows * tl_pad * 4
                + 4 * 1024 * 1024)
    vmem_bytes = int(min(max(vmem_est, 32 * 1024 * 1024), int(0.75 * cap)))

    cp_kwargs = dict(dimension_semantics=("parallel", "parallel"),
                     vmem_limit_bytes=vmem_bytes)
    if allow_input_fusion:
        cp_kwargs["allow_input_fusion"] = [True, True]

    partials = pl.pallas_call(
        kernel,
        grid=(num_rows, num_cols),
        in_specs=[pl.BlockSpec((tile_b, tile_l), lambda i, j: (i, j)),
                  pl.BlockSpec((tile_b, tile_l), lambda i, j: (i, j))],
        out_specs=pl.BlockSpec((_SUB, 128), lambda i, j: (i, j)),
        out_shape=jax.ShapeDtypeStruct((num_rows * _SUB, num_cols * 128),
                                       jnp.float32),
        scratch_shapes=[pltpu.VMEM((sub_rows, tile_l), jnp.float32)],
        compiler_params=pltpu.CompilerParams(**cp_kwargs),
    )(pred2d, tgt2d)

    # Each (8,128) block is filled with its partial sum; pick one
    # representative per block and finish the tiny reduction here.
    return jnp.sum(partials[::_SUB, ::128])


def focal_loss_multilabel(pred, target, *, alpha=0.25, gamma=2,
                          size_average=True, max_tile_rows=1024):
    """Pallas implementation of FocalLoss_MultiLabel.forward.

    pred, target: (B, L) arrays.  target must hold strict 0/1 labels (any
    numeric dtype; int8 recommended to cut HBM traffic).  pred may be bf16
    where precision allows -- the kernel upcasts to f32 internally.
    Returns a scalar float32 loss.
    """
    assert pred.shape == target.shape and pred.ndim == 2
    B, L = pred.shape
    n = B * L

    # Keep gamma a static Python int when possible (integer pow -> VPU muls).
    g = float(gamma)
    gamma_static = int(g) if g.is_integer() else float(g)

    # Keep inputs in their native dtype; upcast happens inside the kernel.
    if target.dtype == jnp.bool_:
        target = target.astype(jnp.int8)

    if L >= _SMALL_L:
        # Zero-copy path: tile the (B, L) arrays directly and mask the ragged
        # edge blocks in-kernel.  No flatten / pad / reshape HBM pass.
        total = _focal_partial_sums(pred, target, alpha=alpha,
                                    gamma=gamma_static,
                                    max_tile_rows=max_tile_rows)
    else:
        # Small label count: lane-dense fallback.  Flatten and pad with
        # (pred=1, target=1), which contributes exactly zero loss; the pad is
        # minimal (to the next multiple of 1024 elements only) and XLA may
        # fuse it into the input DMA via allow_input_fusion.
        rows = max(1, pl.cdiv(n, _LANE))
        padded = rows * _LANE
        pred_f = pred.reshape(-1)
        tgt_f = target.reshape(-1)
        if padded != n:
            pred_f = jnp.pad(pred_f, (0, padded - n), constant_values=1)
            tgt_f = jnp.pad(tgt_f, (0, padded - n), constant_values=1)
        total = _focal_partial_sums(pred_f.reshape(rows, _LANE),
                                    tgt_f.reshape(rows, _LANE),
                                    alpha=alpha, gamma=gamma_static,
                                    max_tile_rows=max_tile_rows,
                                    allow_input_fusion=True)

    if size_average:
        return total / jnp.float32(n)     # mean over batch, then over labels
    return total                          # sum over batch, then over labels


def _reference(pred, target, alpha=0.25, gamma=2, size_average=True):
    # Pure-JAX reference mirroring the PyTorch module exactly.
    p = pred.astype(jnp.float32)
    t = target.astype(jnp.float32)
    sel = jnp.where(t > 0.5, p, 1.0 - p)
    probs = jnp.clip(sel, 0.0001, 1.0)
    a = jnp.where(t > 0.5, alpha, 1.0 - alpha)
    elem = -a * (1.0 - probs) ** gamma * jnp.log(probs)
    if size_average:
        return jnp.mean(jnp.mean(elem, axis=0))   # per-label mean, then mean
    return jnp.sum(jnp.sum(elem, axis=0))


if __name__ == "__main__":
    key = jax.random.PRNGKey(0)
    k1, k2, k3, k4, k5, k6 = jax.random.split(key, 6)

    # 1) Small label count (lane-dense fallback path), mean and sum modes.
    B, L = 8, 4
    pred = jax.random.uniform(k1, (B, L), dtype=jnp.float32)
    target = (jax.random.uniform(k2, (B, L)) > 0.5).astype(jnp.float32)

    loss = focal_loss_multilabel(pred, target, alpha=0.25, gamma=2,
                                 size_average=True)
    jax.block_until_ready(loss)
    ref = _reference(pred, target)
    assert jnp.allclose(loss, ref, rtol=1e-5, atol=1e-6), (loss, ref)

    loss_sum = focal_loss_multilabel(pred, target, size_average=False)
    jax.block_until_ready(loss_sum)
    ref_sum = _reference(pred, target, size_average=False)
    assert jnp.allclose(loss_sum, ref_sum, rtol=1e-5, atol=1e-5), (loss_sum,
                                                                   ref_sum)

    # Non-integer gamma exercises the guarded pow path (incl. q == 0 padding).
    loss_g = focal_loss_multilabel(pred, target, gamma=2.5)
    jax.block_until_ready(loss_g)
    ref_g = _reference(pred, target, gamma=2.5)
    assert jnp.allclose(loss_g, ref_g, rtol=1e-5, atol=1e-6), (loss_g, ref_g)

    # 2) Direct zero-copy path with a ragged row edge (200 % tile != 0).
    B2, L2 = 200, 80
    pred2 = jax.random.uniform(k3, (B2, L2), dtype=jnp.float32)
    target2 = (jax.random.uniform(k4, (B2, L2)) > 0.5).astype(jnp.float32)
    loss2 = focal_loss_multilabel(pred2, target2)
    jax.block_until_ready(loss2)
    ref2 = _reference(pred2, target2)
    assert jnp.allclose(loss2, ref2, rtol=1e-4, atol=1e-5), (loss2, ref2)

    # 3) Wide label dim (column tiling + ragged column mask) with narrow
    #    dtypes (bf16 pred, int8 target) to exercise reduced HBM traffic.
    B3, L3 = 16, 2200
    pred3 = jax.random.uniform(k5, (B3, L3),
                               dtype=jnp.float32).astype(jnp.bfloat16)
    target3 = (jax.random.uniform(k6, (B3, L3)) > 0.5).astype(jnp.int8)
    loss3 = focal_loss_multilabel(pred3, target3)
    jax.block_until_ready(loss3)
    ref3 = _reference(pred3, target3)
    assert jnp.allclose(loss3, ref3, rtol=1e-4, atol=1e-5), (loss3, ref3)

    print("KERNEL_OK")
</pallas_src>

<mosaic_0001>
module attributes {stable_mosaic.version = 11 : i64} {
  func.func @_focal_partial_kernel(%arg0: i32, %arg1: i32, %arg2: memref<1x1024xf32, #tpu.memory_space<vmem>>, %arg3: memref<1x1024xf32, #tpu.memory_space<vmem>>, %arg4: memref<8x128xf32, #tpu.memory_space<vmem>>, %arg5: memref<1x1024xf32, #tpu.memory_space<vmem>>) attributes {dimension_semantics = [#tpu.dimension_semantics<parallel>, #tpu.dimension_semantics<parallel>], iteration_bounds = array<i64: 1, 1>, scalar_prefetch = 0 : i64, scratch_operands = 1 : i64, tpu.core_type = #tpu.core_type<tc>, window_params = [{transform_indices = @transform_0, window_bounds = array<i64: 1, 1024>}, {transform_indices = @transform_1, window_bounds = array<i64: 1, 1024>}, {transform_indices = @transform_2, window_bounds = array<i64: 8, 128>}]} {
    %c0 = arith.constant 0 : index
    %c0_0 = arith.constant 0 : index
    %0 = vector.load %arg2[%c0, %c0_0] : memref<1x1024xf32, #tpu.memory_space<vmem>>, vector<1x1024xf32>
    %c0_1 = arith.constant 0 : index
    %c0_2 = arith.constant 0 : index
    %1 = vector.load %arg3[%c0_1, %c0_2] : memref<1x1024xf32, #tpu.memory_space<vmem>>, vector<1x1024xf32>
    %cst = arith.constant 5.000000e-01 : f32
    %2 = vector.broadcast %cst : f32 to vector<1x1024xf32>
    %3 = arith.cmpf ogt, %1, %2 : vector<1x1024xf32>
    %cst_3 = arith.constant 1.000000e+00 : f32
    %4 = vector.broadcast %cst_3 : f32 to vector<1x1024xf32>
    %5 = arith.subf %4, %0 : vector<1x1024xf32>
    %6 = arith.select %3, %0, %5 : vector<1x1024xi1>, vector<1x1024xf32>
    %cst_4 = arith.constant 9.99999974E-5 : f32
    %cst_5 = arith.constant 1.000000e+00 : f32
    %7 = vector.broadcast %cst_4 : f32 to vector<1x1024xf32>
    %8 = arith.maximumf %7, %6 : vector<1x1024xf32>
    %9 = vector.broadcast %cst_5 : f32 to vector<1x1024xf32>
    %10 = arith.minimumf %9, %8 : vector<1x1024xf32>
    %11 = math.log %10 : vector<1x1024xf32>
    %cst_6 = arith.constant -2.500000e-01 : f32
    %cst_7 = arith.constant -7.500000e-01 : f32
    %12 = vector.broadcast %cst_6 : f32 to vector<1x1024xf32>
    %13 = vector.broadcast %cst_7 : f32 to vector<1x1024xf32>
    %14 = arith.select %3, %12, %13 : vector<1x1024xi1>, vector<1x1024xf32>
    %cst_8 = arith.constant 1.000000e+00 : f32
    %15 = vector.broadcast %cst_8 : f32 to vector<1x1024xf32>
    %16 = arith.subf %15, %10 : vector<1x1024xf32>
    %17 = arith.mulf %16, %16 : vector<1x1024xf32>
    %18 = arith.mulf %14, %17 : vector<1x1024xf32>
    %19 = arith.mulf %18, %11 : vector<1x1024xf32>
    %20 = vector.shape_cast %19 : vector<1x1024xf32> to vector<1x1x1024xf32>
    %cst_9 = arith.constant dense<0.000000e+00> : vector<1xf32>
    %21 = vector.multi_reduction <add>, %20, %cst_9 [1, 2] : vector<1x1x1024xf32> to vector<1xf32>
    %22 = vector.shape_cast %21 : vector<1xf32> to vector<1x1x1xf32>
    %23 = vector.extract %22[0, 0, 0] : f32 from vector<1x1x1xf32>
    %24 = vector.broadcast %23 : f32 to vector<8x128xf32>
    %c0_10 = arith.constant 0 : index
    %c0_11 = arith.constant 0 : index
    %25 = vector.load %arg4[%c0_10, %c0_11] : memref<8x128xf32, #tpu.memory_space<vmem>>, vector<8x128xf32>
    tpu.vector_store %arg4[%c0_10, %c0_11], %24 {strides = array<i32>} : memref<8x128xf32, #tpu.memory_space<vmem>>, vector<8x128xf32>,
    return
  }
  func.func @transform_0(%arg0: i32, %arg1: i32) -> (i32, i32) {
    %c0_i32 = arith.constant 0 : i32
    return %arg0, %arg1 : i32, i32
  }
  func.func @transform_1(%arg0: i32, %arg1: i32) -> (i32, i32) {
    %c0_i32 = arith.constant 0 : i32
    return %arg0, %arg1 : i32, i32
  }
  func.func @transform_2(%arg0: i32, %arg1: i32) -> (i32, i32) {
    %c0_i32 = arith.constant 0 : i32
    return %arg0, %arg1 : i32, i32
  }
}

</mosaic_0001>

<bundles_post_ra>
// kernel: tpu_custom_call.1
= control target key start
LH: loop header
LB: loop body
LE: loop exit
PB: predicated region body
PF: predicated region fallthrough
CT: control target
= control target key end

     0   :  { %7 = vsyncpa [#allocation4], 0  ;;  %s244_s0 = inlined_call_operand.hbm [shape: f32[1,1024], index: 0, kind: input, shape index: {}]   ;;  %s245_s1 = inlined_call_operand.hbm [shape: f32[1,1024], index: 1, kind: input, shape index: {}]   ;;  %s246_s2 = inlined_call_operand.hbm [shape: f32[8,128], index: 2, kind: output, shape index: {}]  }
   0x1   :  { %8 = vsyncpa [#allocation7], 0 }
   0x2   :  { %9 = vsyncpa [#allocation5], 0  ;;  %s208_s9 = smov [#allocation3]   ;;  %s209_s11 = smov [#allocation6]  }
   0x3   :  { %s16_s10 = sshll.u32 %s208_s9, 4  ;;  %s26_s12 = sshll.u32 %s209_s11, 4  ;;  %s17_s10 = int_to_ptr.vmem [resolvable:$true] %s16_s10  ;;  %s27_s12 = int_to_ptr.vmem [resolvable:$true] %s26_s12 }
   0x4   :  { %s150_s13 = scalar_lea.vmem %s17_s10, 128  ;;  %p155_p1 = scmp.lt.s32.totalorder %s17_s10, %s17_s10 }
   0x5   :  { %p151_p0 = scmp.ne.s32.totalorder %s17_s10, %s150_s13  ;;  %p156_p2 = scmp.lt.s32.totalorder %s150_s13, %s150_s13 }
   0x7   :  { %p157_p3 = por %p156_p2, %p155_p1 }
   0x9   :  { %p158_p4 = pnand %p157_p3, %p151_p0 }
   0xb   :  { %161 = shalt.err (!%p158_p4)
}
   0xc   :  { %19 = dma.hbm_to_vmem [thread:$0]  %s244_s0, 128, %s17_s10, [#allocation4]  }
   0xd   :  { %s170_s16 = scalar_lea.vmem %s27_s12, 128  ;;  %p175_p6 = scmp.lt.s32.totalorder %s27_s12, %s27_s12 }
   0xe   :  { %p171_p5 = scmp.ne.s32.totalorder %s27_s12, %s170_s16  ;;  %p176_p7 = scmp.lt.s32.totalorder %s170_s16, %s170_s16 }
  0x10   :  { %p177_p8 = por %p176_p7, %p175_p6 }
  0x12   :  { %p178_p9 = pnand %p177_p8, %p171_p5 }
  0x14   :  { %181 = shalt.err (!%p178_p9)
}
  0x15   :  { %29 = dma.hbm_to_vmem [thread:$0]  %s245_s1, 128, %s27_s12, [#allocation7]  }
  0x16   :  { %202 = dma.done.wait [#allocation4], 128  }
  0x17   :  { %203 = vsyncadd [#allocation4], 4294967168 }
  0x18   :  { %204 = dma.done.wait [#allocation7], 128  }
  0x19   :  { %205 = vsyncadd [#allocation7], 4294967168  ;;  %v36_v0 = vld [vmem:[#allocation3] sm:$0xff]  ;;  %v37_v1 = vld [vmem:[#allocation6] sm:$0xff]  ;;  %v51_v7 = vlaneseq  ;;  %v210_v9 = vmov -0.75   ;;  %vm91_vm1 = vcmask 1040384  }
  0x1a   :  { %vm38_vm0 = vcmp.gt.f32.partialorder %v37_v1, 0.5  ;;  %v39_v2 = vsub.f32 1.0, %v36_v0  ;;  %s211_s0 = smov [#allocation8]  }
  0x1b   :  { %v45_v10 = vsel %vm38_vm0, -0.25, %v210_v9  ;;  %v52_v11 = vshrl.u32 %v51_v7, 7  ;;  %s124_s1 = sshll.u32 %s211_s0, 4  ;;  %s125_s1 = int_to_ptr.vmem [resolvable:$true] %s124_s1 }
  0x1c   :  { %v40_v3 = vsel %vm38_vm0, %v36_v0, %v39_v2  ;;  %s182_s20 = scalar_lea.vmem %s125_s1, 128  ;;  %p187_p11 = scmp.lt.s32.totalorder %s125_s1, %s125_s1 }
  0x1d   :  { %v41_v4 = vmax.f32 %v40_v3, 0.0001  ;;  %v53_v14 = vsub.s32 0, %v52_v11  ;;  %v57_v16 = vsub.s32 1, %v52_v11  ;;  %v61_v17 = vsub.s32 2, %v52_v11  ;;  %p183_p10 = scmp.ne.s32.totalorder %s125_s1, %s182_s20  ;;  %p188_p12 = scmp.lt.s32.totalorder %s182_s20, %s182_s20 }
  0x1e   :  { %v65_v18 = vsub.s32 3, %v52_v11  ;;  %v69_v20 = vsub.s32 4, %v52_v11  ;;  %v73_v21 = vsub.s32 5, %v52_v11  ;;  %v77_v26 = vsub.s32 6, %v52_v11 }
  0x1f   :  { %v42_v5 = vmin.f32 %v41_v4, 1.0  ;;  %v81_v33 = vsub.s32 7, %v52_v11  ;;  %p189_p13 = por %p188_p12, %p187_p11 }
  0x21   :  { %140 = vlog2.f32 %v42_v5  ;;  %v46_v6 = vsub.f32 1.0, %v42_v5  ;;  %p190_p0 = pnand %p189_p13, %p183_p10 }
  0x23   :  { %v47_v8 = vmul.f32 %v46_v6, %v46_v6 }
  0x25   :  { %v48_v12 = vmul.f32 %v47_v8, %v45_v10 }
  0x2e   :  { %v141_v13 = vpop.eup %140 }
  0x2f   :  { %v44_v15 = vmul.f32 0.6931472, %v141_v13 }
  0x31   :  { %v49_v19 = vmul.f32 %v48_v12, %v44_v15 }
  0x33   :  { %v54_v22 = vrot.slane %v49_v19, %v53_v14  ;;  %v58_v23 = vrot.slane %v49_v19, %v57_v16  ;;  %v62_v24 = vrot.slane %v49_v19, %v61_v17  ;;  %v66_v25 = vrot.slane %v49_v19, %v65_v18 }
  0x34   :  { %v70_v27 = vrot.slane %v49_v19, %v69_v20  ;;  %v74_v32 = vrot.slane %v49_v19, %v73_v21  ;;  %v78_v36 = vrot.slane %v49_v19, %v77_v26  ;;  %v82_v39 = vrot.slane %v49_v19, %v81_v33 }
  0x35   :  { %v92_v28 = vsel %vm91_vm1, %v54_v22, 0.0  ;;  %v93_v29 = vsel %vm91_vm1, %v58_v23, 0.0  ;;  %v95_v30 = vsel %vm91_vm1, %v62_v24, 0.0  ;;  %v97_v34 = vsel %vm91_vm1, %v66_v25, 0.0 }
  0x36   :  { %v94_v31 = vadd.f32 %v93_v29, %v92_v28  ;;  %v99_v37 = vsel %vm91_vm1, %v70_v27, 0.0  ;;  %v101_v40 = vsel %vm91_vm1, %v74_v32, 0.0  ;;  %v103_v42 = vsel %vm91_vm1, %v78_v36, 0.0 }
  0x37   :  { %v105_v44 = vsel %vm91_vm1, %v82_v39, 0.0 }
  0x38   :  { %v96_v35 = vadd.f32 %v95_v30, %v94_v31 }
  0x3a   :  { %v98_v38 = vadd.f32 %v97_v34, %v96_v35 }
  0x3c   :  { %v100_v41 = vadd.f32 %v99_v37, %v98_v38 }
  0x3e   :  { %v102_v43 = vadd.f32 %v101_v40, %v100_v41 }
  0x40   :  { %v104_v45 = vadd.f32 %v103_v42, %v102_v43 }
  0x42   :  { %v106_v46 = vadd.f32 %v105_v44, %v104_v45 }
  0x44   :  { %107 = vadd.xlane.f32.xlu0 %v106_v46 }
  0xcd   :  { %v108_v47 = vpop.xlane.xlu0 %107 }
  0xce   :  { %v109_v48 = vrot.slane %v108_v47, 4 }
  0xd0   :  { %v110_v49 = vadd.f32 %v109_v48, %v108_v47 }
  0xd2   :  { %v111_v50 = vrot.slane %v110_v49, 2 }
  0xd4   :  { %v112_v51 = vadd.f32 %v111_v50, %v110_v49 }
  0xd6   :  { %v113_v52 = vrot.slane %v112_v51, 1 }
  0xd8   :  { %v114_v53 = vadd.f32 %v113_v52, %v112_v51 }
  0xda   :  { %134 = vpush %v114_v53 }
 0x10b   :  { %s135_s19 = spop %134 }
 0x10c   :  { %v116_v54 = vstv %s135_s19 }
 0x10d   :  { %117 = vst [vmem:[#allocation8] sm:$0xff] %v116_v54 }
 0x10e   :  { %193 = shalt.err (!%p190_p0)
}
 0x10f   :  { %127 = dma.vmem_to_hbm [thread:$0]  %s125_s1, 128, %s246_s2, [#allocation5]  }
 0x110   :  { %206 = dma.done.wait [#allocation5], 128  }
 0x111   :  { %207 = vsyncadd [#allocation5], 4294967168 }
 0x112   :  { %131 = vsyncpa [#allocation4], 1 }
 0x113   :  { %132 = vsyncpa [#allocation7], 1 }
 0x114   :  { %133 = vsyncpa [#allocation5], 1 }

</bundles_post_ra>
